<compile_context>
chip_gen: v5e
topology: v5e:2x2
jax: 0.10.0
libtpu: 0.0.40
codegen_flags: <defaults>
</compile_context>

<pallas_src>
import numpy as np
import jax
import jax.numpy as jnp
from jax.experimental import pallas as pl
from jax.experimental.pallas import tpu as pltpu

# --- model hyperparameters (small, consistent with the module) ---
INPUT_SIZE = 32
NUM_SPEC = 2           # num_specific_experts
NUM_SHARED = 2         # num_shared_experts
EXPERTS_OUT = 16
EXPERTS_HIDDEN = 32
TOWERS_HIDDEN = 16
BATCH = 8

E = 2 * NUM_SPEC + NUM_SHARED      # 6 experts per layer
HID = EXPERTS_HIDDEN               # 32
OUT = EXPERTS_OUT                  # 16
G12 = NUM_SPEC + NUM_SHARED        # 4 (task gates)
GSH = 2 * NUM_SPEC + NUM_SHARED    # 6 (shared gate)

_VMEM = pl.BlockSpec(memory_space=pltpu.MemorySpace.VMEM)


# ------------------------- in-kernel helpers -------------------------

def _softmax(z):
    z = z - jnp.max(z, axis=-1, keepdims=True)
    ez = jnp.exp(z)
    return ez / jnp.sum(ez, axis=-1, keepdims=True)


def _mix(o_all, sel, experts):
    """Weighted sum of expert slabs; expert e lives in lanes [e*OUT, (e+1)*OUT)."""
    acc = o_all[:, experts[0] * OUT:(experts[0] + 1) * OUT] * sel[:, 0:1]
    for a in range(1, len(experts)):
        e = experts[a]
        acc = acc + o_all[:, e * OUT:(e + 1) * OUT] * sel[:, a:a + 1]
    return acc


# ------------------------- fused Pallas kernel -------------------------

def ple_kernel(x_ref,
               hw1_ref, hb1_ref, hw2_ref, hb2_ref,
               ow1_ref, ob1_ref, ow2_ref, ob2_ref,
               tw1_ref, tb1_ref, tw2_ref, tb2_ref,
               out_ref):
    x = x_ref[...]

    # ---------------- hidden PLE layer ----------------
    # One matmul covers all 6 expert fc1's (lane-packed) AND the 3 gate linears.
    z = jnp.dot(x, hw1_ref[...], preferred_element_type=jnp.float32) + hb1_ref[...]
    h_all = jnp.maximum(z[:, :E * HID], 0.0)                                # (B, 192)
    # all 6 expert fc2's as one block-diagonal matmul
    o_all = jnp.dot(h_all, hw2_ref[...],
                    preferred_element_type=jnp.float32) + hb2_ref[...]      # (B, 96)
    glog = z[:, E * HID:]                                                   # (B, 14)
    sel1 = _softmax(glog[:, 0:G12])
    sel2 = _softmax(glog[:, G12:2 * G12])
    sels = _softmax(glog[:, 2 * G12:2 * G12 + GSH])

    # expert order: [task1_0, task1_1, task2_0, task2_1, shared_0, shared_1]
    g1 = _mix(o_all, sel1, [0, 1, 4, 5])
    g2 = _mix(o_all, sel2, [2, 3, 4, 5])
    gs = _mix(o_all, sels, [0, 1, 2, 3, 4, 5])

    # ---------------- output PLE layer ----------------
    xcat = jnp.concatenate([g1, g2, gs], axis=1)                            # (B, 48)
    # block-structured fc1 for the 3 input groups + the 2 output gates, one matmul
    z2 = jnp.dot(xcat, ow1_ref[...], preferred_element_type=jnp.float32) + ob1_ref[...]
    h2_all = jnp.maximum(z2[:, :E * HID], 0.0)                              # (B, 192)
    o2_all = jnp.dot(h2_all, ow2_ref[...],
                     preferred_element_type=jnp.float32) + ob2_ref[...]     # (B, 96)
    glog2 = z2[:, E * HID:]                                                 # (B, 8)
    s1 = _softmax(glog2[:, 0:G12])
    s2 = _softmax(glog2[:, G12:2 * G12])
    t1_in = _mix(o2_all, s1, [0, 1, 4, 5])
    t2_in = _mix(o2_all, s2, [2, 3, 4, 5])

    # ---------------- towers (both fused, block-diagonal) ----------------
    tin = jnp.concatenate([t1_in, t2_in], axis=1)                           # (B, 32)
    ht = jnp.maximum(jnp.dot(tin, tw1_ref[...],
                             preferred_element_type=jnp.float32) + tb1_ref[...], 0.0)
    f = jnp.dot(ht, tw2_ref[...], preferred_element_type=jnp.float32) + tb2_ref[...]
    out_ref[...] = f.astype(out_ref.dtype)                                  # (B, 2)


# ------------------------- wrapper: parameter packing -------------------------

def _block_diag(blocks):
    rows = sum(b.shape[0] for b in blocks)
    cols = sum(b.shape[1] for b in blocks)
    out = jnp.zeros((rows, cols), blocks[0].dtype)
    r = c = 0
    for b in blocks:
        out = out.at[r:r + b.shape[0], c:c + b.shape[1]].set(b)
        r += b.shape[0]
        c += b.shape[1]
    return out


def pack_params(params):
    hp, op = params["hidden"], params["output"]

    # --- hidden layer ---
    # fc1 of every expert lane-packed (pre-transposed to [in,out]) + 3 gates appended
    hw1 = jnp.concatenate([hp["w1"][e].T for e in range(E)]
                          + [hp["wg1"].T, hp["wg2"].T, hp["wgs"].T], axis=1)   # (32, 206)
    hb1 = jnp.concatenate([hp["b1"].reshape(1, -1),
                           hp["bg1"], hp["bg2"], hp["bgs"]], axis=1)           # (1, 206)
    hw2 = _block_diag([hp["w2"][e].T for e in range(E)])                       # (192, 96)
    hb2 = hp["b2"].reshape(1, -1)                                              # (1, 96)

    # --- output layer ---
    # per-group fc1 blocks (task1 experts see g1, task2 see g2, shared see gs)
    g1_blk = jnp.concatenate([op["w1"][0].T, op["w1"][1].T], axis=1)           # (16, 64)
    g2_blk = jnp.concatenate([op["w1"][2].T, op["w1"][3].T], axis=1)
    gs_blk = jnp.concatenate([op["w1"][4].T, op["w1"][5].T], axis=1)
    ow1_bd = _block_diag([g1_blk, g2_blk, gs_blk])                             # (48, 192)
    # gates: gate1 reads the g1 slab, gate2 reads the g2 slab, gs slab unused
    owg = jnp.zeros((3 * OUT, 2 * G12), jnp.float32)
    owg = owg.at[0:OUT, 0:G12].set(op["wg1"].T)
    owg = owg.at[OUT:2 * OUT, G12:2 * G12].set(op["wg2"].T)
    ow1 = jnp.concatenate([ow1_bd, owg], axis=1)                               # (48, 200)
    ob1 = jnp.concatenate([op["b1"].reshape(1, -1), op["bg1"], op["bg2"]], axis=1)
    ow2 = _block_diag([op["w2"][e].T for e in range(E)])                       # (192, 96)
    ob2 = op["b2"].reshape(1, -1)                                              # (1, 96)

    # --- towers ---
    tw1 = _block_diag([op["t1w1"].T, op["t2w1"].T])                            # (32, 32)
    tb1 = jnp.concatenate([op["t1b1"], op["t2b1"]], axis=1)                    # (1, 32)
    tw2 = _block_diag([op["t1w2"].T, op["t2w2"].T])                            # (32, 2)
    tb2 = jnp.concatenate([op["t1b2"], op["t2b2"]], axis=1)                    # (1, 2)

    return (hw1, hb1, hw2, hb2, ow1, ob1, ow2, ob2, tw1, tb1, tw2, tb2)


def ple_forward(x, packed):
    B = x.shape[0]
    args = (x,) + tuple(packed)
    f = pl.pallas_call(
        ple_kernel,
        out_shape=jax.ShapeDtypeStruct((B, 2), jnp.float32),
        in_specs=[_VMEM] * len(args),
        out_specs=_VMEM,
    )(*args)
    # TODO(synk): if batch grows, add a batch grid with dimension_semantics=("parallel",)
    # so both v7x TensorCores are used; at B=8 a gridless kernel is optimal.
    return f[:, 0:1], f[:, 1:2]


# ------------------------- deterministic parameter init -------------------------

def _init_linear(key, out_f, in_f):
    k1, k2 = jax.random.split(key)
    bound = 1.0 / np.sqrt(in_f)
    w = jax.random.uniform(k1, (out_f, in_f), jnp.float32, -bound, bound)
    b = jax.random.uniform(k2, (out_f,), jnp.float32, -bound, bound)
    return w, b


def _make_expert(key, in_f, hid, out_f):
    k1, k2 = jax.random.split(key)
    w1, b1 = _init_linear(k1, hid, in_f)
    w2, b2 = _init_linear(k2, out_f, hid)
    return w1, b1, w2, b2


def init_hidden_params(key, in_f, ns, nh, out_f, hid):
    n_exp = 2 * ns + nh
    keys = jax.random.split(key, n_exp + 3)
    experts = [_make_expert(keys[i], in_f, hid, out_f) for i in range(n_exp)]
    wg1, bg1 = _init_linear(keys[n_exp + 0], ns + nh, in_f)
    wg2, bg2 = _init_linear(keys[n_exp + 1], ns + nh, in_f)
    wgs, bgs = _init_linear(keys[n_exp + 2], 2 * ns + nh, in_f)
    return dict(
        w1=jnp.stack([e[0] for e in experts]), b1=jnp.stack([e[1] for e in experts]),
        w2=jnp.stack([e[2] for e in experts]), b2=jnp.stack([e[3] for e in experts]),
        wg1=wg1, bg1=bg1.reshape(1, -1),
        wg2=wg2, bg2=bg2.reshape(1, -1),
        wgs=wgs, bgs=bgs.reshape(1, -1))


def init_output_params(key, in_f, ns, nh, out_f, hid, tower_hid):
    n_exp = 2 * ns + nh
    keys = jax.random.split(key, n_exp + 6)
    experts = [_make_expert(keys[i], in_f, hid, out_f) for i in range(n_exp)]
    wg1, bg1 = _init_linear(keys[n_exp + 0], ns + nh, in_f)
    wg2, bg2 = _init_linear(keys[n_exp + 1], ns + nh, in_f)
    t1w1, t1b1 = _init_linear(keys[n_exp + 2], tower_hid, out_f)
    t1w2, t1b2 = _init_linear(keys[n_exp + 3], 1, tower_hid)
    t2w1, t2b1 = _init_linear(keys[n_exp + 4], tower_hid, out_f)
    t2w2, t2b2 = _init_linear(keys[n_exp + 5], 1, tower_hid)
    return dict(
        w1=jnp.stack([e[0] for e in experts]), b1=jnp.stack([e[1] for e in experts]),
        w2=jnp.stack([e[2] for e in experts]), b2=jnp.stack([e[3] for e in experts]),
        wg1=wg1, bg1=bg1.reshape(1, -1),
        wg2=wg2, bg2=bg2.reshape(1, -1),
        t1w1=t1w1, t1b1=t1b1.reshape(1, -1), t1w2=t1w2, t1b2=t1b2.reshape(1, -1),
        t2w1=t2w1, t2b1=t2b1.reshape(1, -1), t2w2=t2w2, t2b2=t2b2.reshape(1, -1))


# ------------------------- pure-JAX reference (for sanity check) -------------------------

def _ref_expert(x, w1, b1, w2, b2):
    h = jnp.maximum(x @ w1.T + b1, 0.0)
    return h @ w2.T + b2


def _ref_gate(x, wg, bg):
    return jax.nn.softmax(x @ wg.T + bg, axis=-1)


def _ref_mix(outs, sel):
    return sum(o * sel[:, i][:, None] for i, o in enumerate(outs))


def ple_reference(x, params):
    hp, op = params["hidden"], params["output"]
    ns, nh = NUM_SPEC, NUM_SHARED

    def stack(xin, p, rng):
        return [_ref_expert(xin, p["w1"][e], p["b1"][e], p["w2"][e], p["b2"][e]) for e in rng]

    t1 = stack(x, hp, range(0, ns))
    t2 = stack(x, hp, range(ns, 2 * ns))
    sh = stack(x, hp, range(2 * ns, 2 * ns + nh))
    g1 = _ref_mix(t1 + sh, _ref_gate(x, hp["wg1"], hp["bg1"]))
    g2 = _ref_mix(t2 + sh, _ref_gate(x, hp["wg2"], hp["bg2"]))
    gs = _ref_mix(t1 + t2 + sh, _ref_gate(x, hp["wgs"], hp["bgs"]))

    ot1 = stack(g1, op, range(0, ns))
    ot2 = stack(g2, op, range(ns, 2 * ns))
    osh = stack(gs, op, range(2 * ns, 2 * ns + nh))
    og1 = _ref_mix(ot1 + osh, _ref_gate(g1, op["wg1"], op["bg1"]))
    og2 = _ref_mix(ot2 + osh, _ref_gate(g2, op["wg2"], op["bg2"]))
    f1 = jnp.maximum(og1 @ op["t1w1"].T + op["t1b1"], 0.0) @ op["t1w2"].T + op["t1b2"]
    f2 = jnp.maximum(og2 @ op["t2w1"].T + op["t2b1"], 0.0) @ op["t2w2"].T + op["t2b2"]
    return f1, f2


# ------------------------- main -------------------------

if __name__ == "__main__":
    key = jax.random.PRNGKey(0)
    kx, kh, ko = jax.random.split(key, 3)

    x = jax.random.normal(kx, (BATCH, INPUT_SIZE), jnp.float32)
    params = {
        "hidden": init_hidden_params(kh, INPUT_SIZE, NUM_SPEC, NUM_SHARED,
                                     EXPERTS_OUT, EXPERTS_HIDDEN),
        "output": init_output_params(ko, EXPERTS_OUT, NUM_SPEC, NUM_SHARED,
                                     EXPERTS_OUT, EXPERTS_HIDDEN, TOWERS_HIDDEN),
    }

    packed = pack_params(params)
    f1, f2 = ple_forward(x, packed)
    jax.block_until_ready((f1, f2))

    r1, r2 = ple_reference(x, params)
    assert f1.shape == (BATCH, 1) and f2.shape == (BATCH, 1)
    assert np.allclose(np.asarray(f1), np.asarray(r1), rtol=2e-2, atol=2e-3)
    assert np.allclose(np.asarray(f2), np.asarray(r2), rtol=2e-2, atol=2e-3)

    print("KERNEL_OK")
</pallas_src>

<mosaic_0001>
module attributes {stable_mosaic.version = 11 : i64} {
  func.func @ple_kernel(%arg0: memref<8x32xf32, #tpu.memory_space<vmem>>, %arg1: memref<32x206xf32, #tpu.memory_space<vmem>>, %arg2: memref<1x206xf32, #tpu.memory_space<vmem>>, %arg3: memref<192x96xf32, #tpu.memory_space<vmem>>, %arg4: memref<1x96xf32, #tpu.memory_space<vmem>>, %arg5: memref<48x200xf32, #tpu.memory_space<vmem>>, %arg6: memref<1x200xf32, #tpu.memory_space<vmem>>, %arg7: memref<192x96xf32, #tpu.memory_space<vmem>>, %arg8: memref<1x96xf32, #tpu.memory_space<vmem>>, %arg9: memref<32x32xf32, #tpu.memory_space<vmem>>, %arg10: memref<1x32xf32, #tpu.memory_space<vmem>>, %arg11: memref<32x2xf32, #tpu.memory_space<vmem>>, %arg12: memref<1x2xf32, #tpu.memory_space<vmem>>, %arg13: memref<8x2xf32, #tpu.memory_space<vmem>>) attributes {dimension_semantics = [], scalar_prefetch = 0 : i64, scratch_operands = 0 : i64, tpu.core_type = #tpu.core_type<tc>} {
    %c0 = arith.constant 0 : index
    %c0_0 = arith.constant 0 : index
    %0 = vector.load %arg0[%c0, %c0_0] : memref<8x32xf32, #tpu.memory_space<vmem>>, vector<8x32xf32>
    %c0_1 = arith.constant 0 : index
    %c0_2 = arith.constant 0 : index
    %1 = vector.load %arg1[%c0_1, %c0_2] : memref<32x206xf32, #tpu.memory_space<vmem>>, vector<32x206xf32>
    %cst = arith.constant dense<0.000000e+00> : vector<8x206xf32>
    %2 = tpu.matmul %0, %1, %cst {dimension_numbers = #tpu.dot_dimension_numbers<[1], [0], [0], [1], [0, 0, 1, 1], [], []>} : vector<8x32xf32>, vector<32x206xf32>, vector<8x206xf32> -> vector<8x206xf32>
    %c0_3 = arith.constant 0 : index
    %c0_4 = arith.constant 0 : index
    %3 = vector.load %arg2[%c0_3, %c0_4] : memref<1x206xf32, #tpu.memory_space<vmem>>, vector<1x206xf32>
    %4 = vector.broadcast %3 : vector<1x206xf32> to vector<8x206xf32>
    %5 = arith.addf %2, %4 : vector<8x206xf32>
    %6 = vector.extract_strided_slice %5 {offsets = [0, 0], sizes = [8, 192], strides = [1, 1]} : vector<8x206xf32> to vector<8x192xf32>
    %cst_5 = arith.constant 0.000000e+00 : f32
    %7 = vector.broadcast %cst_5 : f32 to vector<8x192xf32>
    %8 = arith.maximumf %6, %7 : vector<8x192xf32>
    %c0_6 = arith.constant 0 : index
    %c0_7 = arith.constant 0 : index
    %9 = vector.load %arg3[%c0_6, %c0_7] : memref<192x96xf32, #tpu.memory_space<vmem>>, vector<192x96xf32>
    %cst_8 = arith.constant dense<0.000000e+00> : vector<8x96xf32>
    %10 = tpu.matmul %8, %9, %cst_8 {dimension_numbers = #tpu.dot_dimension_numbers<[1], [0], [0], [1], [0, 0, 1, 1], [], []>} : vector<8x192xf32>, vector<192x96xf32>, vector<8x96xf32> -> vector<8x96xf32>
    %c0_9 = arith.constant 0 : index
    %c0_10 = arith.constant 0 : index
    %11 = vector.load %arg4[%c0_9, %c0_10] : memref<1x96xf32, #tpu.memory_space<vmem>>, vector<1x96xf32>
    %12 = vector.broadcast %11 : vector<1x96xf32> to vector<8x96xf32>
    %13 = arith.addf %10, %12 : vector<8x96xf32>
    %14 = vector.extract_strided_slice %5 {offsets = [0, 192], sizes = [8, 14], strides = [1, 1]} : vector<8x206xf32> to vector<8x14xf32>
    %15 = vector.extract_strided_slice %14 {offsets = [0, 0], sizes = [8, 4], strides = [1, 1]} : vector<8x14xf32> to vector<8x4xf32>
    %cst_11 = arith.constant dense<0xFF800000> : vector<8xf32>
    %16 = vector.multi_reduction <maximumf>, %15, %cst_11 [1] : vector<8x4xf32> to vector<8xf32>
    %17 = vector.shape_cast %16 : vector<8xf32> to vector<8x1xf32>
    %18 = vector.broadcast %17 : vector<8x1xf32> to vector<8x4xf32>
    %19 = arith.subf %15, %18 : vector<8x4xf32>
    %20 = math.exp %19 : vector<8x4xf32>
    %cst_12 = arith.constant dense<0.000000e+00> : vector<8xf32>
    %21 = vector.multi_reduction <add>, %20, %cst_12 [1] : vector<8x4xf32> to vector<8xf32>
    %22 = vector.shape_cast %21 : vector<8xf32> to vector<8x1xf32>
    %23 = vector.broadcast %22 : vector<8x1xf32> to vector<8x4xf32>
    %24 = arith.divf %20, %23 : vector<8x4xf32>
    %25 = vector.extract_strided_slice %14 {offsets = [0, 4], sizes = [8, 4], strides = [1, 1]} : vector<8x14xf32> to vector<8x4xf32>
    %cst_13 = arith.constant dense<0xFF800000> : vector<8xf32>
    %26 = vector.multi_reduction <maximumf>, %25, %cst_13 [1] : vector<8x4xf32> to vector<8xf32>
    %27 = vector.shape_cast %26 : vector<8xf32> to vector<8x1xf32>
    %28 = vector.broadcast %27 : vector<8x1xf32> to vector<8x4xf32>
    %29 = arith.subf %25, %28 : vector<8x4xf32>
    %30 = math.exp %29 : vector<8x4xf32>
    %cst_14 = arith.constant dense<0.000000e+00> : vector<8xf32>
    %31 = vector.multi_reduction <add>, %30, %cst_14 [1] : vector<8x4xf32> to vector<8xf32>
    %32 = vector.shape_cast %31 : vector<8xf32> to vector<8x1xf32>
    %33 = vector.broadcast %32 : vector<8x1xf32> to vector<8x4xf32>
    %34 = arith.divf %30, %33 : vector<8x4xf32>
    %35 = vector.extract_strided_slice %14 {offsets = [0, 8], sizes = [8, 6], strides = [1, 1]} : vector<8x14xf32> to vector<8x6xf32>
    %cst_15 = arith.constant dense<0xFF800000> : vector<8xf32>
    %36 = vector.multi_reduction <maximumf>, %35, %cst_15 [1] : vector<8x6xf32> to vector<8xf32>
    %37 = vector.shape_cast %36 : vector<8xf32> to vector<8x1xf32>
    %38 = vector.broadcast %37 : vector<8x1xf32> to vector<8x6xf32>
    %39 = arith.subf %35, %38 : vector<8x6xf32>
    %40 = math.exp %39 : vector<8x6xf32>
    %cst_16 = arith.constant dense<0.000000e+00> : vector<8xf32>
    %41 = vector.multi_reduction <add>, %40, %cst_16 [1] : vector<8x6xf32> to vector<8xf32>
    %42 = vector.shape_cast %41 : vector<8xf32> to vector<8x1xf32>
    %43 = vector.broadcast %42 : vector<8x1xf32> to vector<8x6xf32>
    %44 = arith.divf %40, %43 : vector<8x6xf32>
    %45 = vector.extract_strided_slice %13 {offsets = [0, 0], sizes = [8, 16], strides = [1, 1]} : vector<8x96xf32> to vector<8x16xf32>
    %46 = vector.extract_strided_slice %24 {offsets = [0, 0], sizes = [8, 1], strides = [1, 1]} : vector<8x4xf32> to vector<8x1xf32>
    %47 = vector.broadcast %46 : vector<8x1xf32> to vector<8x16xf32>
    %48 = arith.mulf %45, %47 : vector<8x16xf32>
    %49 = vector.extract_strided_slice %13 {offsets = [0, 16], sizes = [8, 16], strides = [1, 1]} : vector<8x96xf32> to vector<8x16xf32>
    %50 = vector.extract_strided_slice %24 {offsets = [0, 1], sizes = [8, 1], strides = [1, 1]} : vector<8x4xf32> to vector<8x1xf32>
    %51 = vector.broadcast %50 : vector<8x1xf32> to vector<8x16xf32>
    %52 = arith.mulf %49, %51 : vector<8x16xf32>
    %53 = arith.addf %48, %52 : vector<8x16xf32>
    %54 = vector.extract_strided_slice %13 {offsets = [0, 64], sizes = [8, 16], strides = [1, 1]} : vector<8x96xf32> to vector<8x16xf32>
    %55 = vector.extract_strided_slice %24 {offsets = [0, 2], sizes = [8, 1], strides = [1, 1]} : vector<8x4xf32> to vector<8x1xf32>
    %56 = vector.broadcast %55 : vector<8x1xf32> to vector<8x16xf32>
    %57 = arith.mulf %54, %56 : vector<8x16xf32>
    %58 = arith.addf %53, %57 : vector<8x16xf32>
    %59 = vector.extract_strided_slice %13 {offsets = [0, 80], sizes = [8, 16], strides = [1, 1]} : vector<8x96xf32> to vector<8x16xf32>
    %60 = vector.extract_strided_slice %24 {offsets = [0, 3], sizes = [8, 1], strides = [1, 1]} : vector<8x4xf32> to vector<8x1xf32>
    %61 = vector.broadcast %60 : vector<8x1xf32> to vector<8x16xf32>
    %62 = arith.mulf %59, %61 : vector<8x16xf32>
    %63 = arith.addf %58, %62 : vector<8x16xf32>
    %64 = vector.extract_strided_slice %13 {offsets = [0, 32], sizes = [8, 16], strides = [1, 1]} : vector<8x96xf32> to vector<8x16xf32>
    %65 = vector.extract_strided_slice %34 {offsets = [0, 0], sizes = [8, 1], strides = [1, 1]} : vector<8x4xf32> to vector<8x1xf32>
    %66 = vector.broadcast %65 : vector<8x1xf32> to vector<8x16xf32>
    %67 = arith.mulf %64, %66 : vector<8x16xf32>
    %68 = vector.extract_strided_slice %13 {offsets = [0, 48], sizes = [8, 16], strides = [1, 1]} : vector<8x96xf32> to vector<8x16xf32>
    %69 = vector.extract_strided_slice %34 {offsets = [0, 1], sizes = [8, 1], strides = [1, 1]} : vector<8x4xf32> to vector<8x1xf32>
    %70 = vector.broadcast %69 : vector<8x1xf32> to vector<8x16xf32>
    %71 = arith.mulf %68, %70 : vector<8x16xf32>
    %72 = arith.addf %67, %71 : vector<8x16xf32>
    %73 = vector.extract_strided_slice %13 {offsets = [0, 64], sizes = [8, 16], strides = [1, 1]} : vector<8x96xf32> to vector<8x16xf32>
    %74 = vector.extract_strided_slice %34 {offsets = [0, 2], sizes = [8, 1], strides = [1, 1]} : vector<8x4xf32> to vector<8x1xf32>
    %75 = vector.broadcast %74 : vector<8x1xf32> to vector<8x16xf32>
    %76 = arith.mulf %73, %75 : vector<8x16xf32>
    %77 = arith.addf %72, %76 : vector<8x16xf32>
    %78 = vector.extract_strided_slice %13 {offsets = [0, 80], sizes = [8, 16], strides = [1, 1]} : vector<8x96xf32> to vector<8x16xf32>
    %79 = vector.extract_strided_slice %34 {offsets = [0, 3], sizes = [8, 1], strides = [1, 1]} : vector<8x4xf32> to vector<8x1xf32>
    %80 = vector.broadcast %79 : vector<8x1xf32> to vector<8x16xf32>
    %81 = arith.mulf %78, %80 : vector<8x16xf32>
    %82 = arith.addf %77, %81 : vector<8x16xf32>
    %83 = vector.extract_strided_slice %13 {offsets = [0, 0], sizes = [8, 16], strides = [1, 1]} : vector<8x96xf32> to vector<8x16xf32>
    %84 = vector.extract_strided_slice %44 {offsets = [0, 0], sizes = [8, 1], strides = [1, 1]} : vector<8x6xf32> to vector<8x1xf32>
    %85 = vector.broadcast %84 : vector<8x1xf32> to vector<8x16xf32>
    %86 = arith.mulf %83, %85 : vector<8x16xf32>
    %87 = vector.extract_strided_slice %13 {offsets = [0, 16], sizes = [8, 16], strides = [1, 1]} : vector<8x96xf32> to vector<8x16xf32>
    %88 = vector.extract_strided_slice %44 {offsets = [0, 1], sizes = [8, 1], strides = [1, 1]} : vector<8x6xf32> to vector<8x1xf32>
    %89 = vector.broadcast %88 : vector<8x1xf32> to vector<8x16xf32>
    %90 = arith.mulf %87, %89 : vector<8x16xf32>
    %91 = arith.addf %86, %90 : vector<8x16xf32>
    %92 = vector.extract_strided_slice %13 {offsets = [0, 32], sizes = [8, 16], strides = [1, 1]} : vector<8x96xf32> to vector<8x16xf32>
    %93 = vector.extract_strided_slice %44 {offsets = [0, 2], sizes = [8, 1], strides = [1, 1]} : vector<8x6xf32> to vector<8x1xf32>
    %94 = vector.broadcast %93 : vector<8x1xf32> to vector<8x16xf32>
    %95 = arith.mulf %92, %94 : vector<8x16xf32>
    %96 = arith.addf %91, %95 : vector<8x16xf32>
    %97 = vector.extract_strided_slice %13 {offsets = [0, 48], sizes = [8, 16], strides = [1, 1]} : vector<8x96xf32> to vector<8x16xf32>
    %98 = vector.extract_strided_slice %44 {offsets = [0, 3], sizes = [8, 1], strides = [1, 1]} : vector<8x6xf32> to vector<8x1xf32>
    %99 = vector.broadcast %98 : vector<8x1xf32> to vector<8x16xf32>
    %100 = arith.mulf %97, %99 : vector<8x16xf32>
    %101 = arith.addf %96, %100 : vector<8x16xf32>
    %102 = vector.extract_strided_slice %13 {offsets = [0, 64], sizes = [8, 16], strides = [1, 1]} : vector<8x96xf32> to vector<8x16xf32>
    %103 = vector.extract_strided_slice %44 {offsets = [0, 4], sizes = [8, 1], strides = [1, 1]} : vector<8x6xf32> to vector<8x1xf32>
    %104 = vector.broadcast %103 : vector<8x1xf32> to vector<8x16xf32>
    %105 = arith.mulf %102, %104 : vector<8x16xf32>
    %106 = arith.addf %101, %105 : vector<8x16xf32>
    %107 = vector.extract_strided_slice %13 {offsets = [0, 80], sizes = [8, 16], strides = [1, 1]} : vector<8x96xf32> to vector<8x16xf32>
    %108 = vector.extract_strided_slice %44 {offsets = [0, 5], sizes = [8, 1], strides = [1, 1]} : vector<8x6xf32> to vector<8x1xf32>
    %109 = vector.broadcast %108 : vector<8x1xf32> to vector<8x16xf32>
    %110 = arith.mulf %107, %109 : vector<8x16xf32>
    %111 = arith.addf %106, %110 : vector<8x16xf32>
    %112 = tpu.concatenate %63, %82, %111 in 1 : vector<8x16xf32>, vector<8x16xf32>, vector<8x16xf32> -> vector<8x48xf32>
    %c0_17 = arith.constant 0 : index
    %c0_18 = arith.constant 0 : index
    %113 = vector.load %arg5[%c0_17, %c0_18] : memref<48x200xf32, #tpu.memory_space<vmem>>, vector<48x200xf32>
    %cst_19 = arith.constant dense<0.000000e+00> : vector<8x200xf32>
    %114 = tpu.matmul %112, %113, %cst_19 {dimension_numbers = #tpu.dot_dimension_numbers<[1], [0], [0], [1], [0, 0, 1, 1], [], []>} : vector<8x48xf32>, vector<48x200xf32>, vector<8x200xf32> -> vector<8x200xf32>
    %c0_20 = arith.constant 0 : index
    %c0_21 = arith.constant 0 : index
    %115 = vector.load %arg6[%c0_20, %c0_21] : memref<1x200xf32, #tpu.memory_space<vmem>>, vector<1x200xf32>
    %116 = vector.broadcast %115 : vector<1x200xf32> to vector<8x200xf32>
    %117 = arith.addf %114, %116 : vector<8x200xf32>
    %118 = vector.extract_strided_slice %117 {offsets = [0, 0], sizes = [8, 192], strides = [1, 1]} : vector<8x200xf32> to vector<8x192xf32>
    %cst_22 = arith.constant 0.000000e+00 : f32
    %119 = vector.broadcast %cst_22 : f32 to vector<8x192xf32>
    %120 = arith.maximumf %118, %119 : vector<8x192xf32>
    %c0_23 = arith.constant 0 : index
    %c0_24 = arith.constant 0 : index
    %121 = vector.load %arg7[%c0_23, %c0_24] : memref<192x96xf32, #tpu.memory_space<vmem>>, vector<192x96xf32>
    %cst_25 = arith.constant dense<0.000000e+00> : vector<8x96xf32>
    %122 = tpu.matmul %120, %121, %cst_25 {dimension_numbers = #tpu.dot_dimension_numbers<[1], [0], [0], [1], [0, 0, 1, 1], [], []>} : vector<8x192xf32>, vector<192x96xf32>, vector<8x96xf32> -> vector<8x96xf32>
    %c0_26 = arith.constant 0 : index
    %c0_27 = arith.constant 0 : index
    %123 = vector.load %arg8[%c0_26, %c0_27] : memref<1x96xf32, #tpu.memory_space<vmem>>, vector<1x96xf32>
    %124 = vector.broadcast %123 : vector<1x96xf32> to vector<8x96xf32>
    %125 = arith.addf %122, %124 : vector<8x96xf32>
    %126 = vector.extract_strided_slice %117 {offsets = [0, 192], sizes = [8, 8], strides = [1, 1]} : vector<8x200xf32> to vector<8x8xf32>
    %127 = vector.extract_strided_slice %126 {offsets = [0, 0], sizes = [8, 4], strides = [1, 1]} : vector<8x8xf32> to vector<8x4xf32>
    %cst_28 = arith.constant dense<0xFF800000> : vector<8xf32>
    %128 = vector.multi_reduction <maximumf>, %127, %cst_28 [1] : vector<8x4xf32> to vector<8xf32>
    %129 = vector.shape_cast %128 : vector<8xf32> to vector<8x1xf32>
    %130 = vector.broadcast %129 : vector<8x1xf32> to vector<8x4xf32>
    %131 = arith.subf %127, %130 : vector<8x4xf32>
    %132 = math.exp %131 : vector<8x4xf32>
    %cst_29 = arith.constant dense<0.000000e+00> : vector<8xf32>
    %133 = vector.multi_reduction <add>, %132, %cst_29 [1] : vector<8x4xf32> to vector<8xf32>
    %134 = vector.shape_cast %133 : vector<8xf32> to vector<8x1xf32>
    %135 = vector.broadcast %134 : vector<8x1xf32> to vector<8x4xf32>
    %136 = arith.divf %132, %135 : vector<8x4xf32>
    %137 = vector.extract_strided_slice %126 {offsets = [0, 4], sizes = [8, 4], strides = [1, 1]} : vector<8x8xf32> to vector<8x4xf32>
    %cst_30 = arith.constant dense<0xFF800000> : vector<8xf32>
    %138 = vector.multi_reduction <maximumf>, %137, %cst_30 [1] : vector<8x4xf32> to vector<8xf32>
    %139 = vector.shape_cast %138 : vector<8xf32> to vector<8x1xf32>
    %140 = vector.broadcast %139 : vector<8x1xf32> to vector<8x4xf32>
    %141 = arith.subf %137, %140 : vector<8x4xf32>
    %142 = math.exp %141 : vector<8x4xf32>
    %cst_31 = arith.constant dense<0.000000e+00> : vector<8xf32>
    %143 = vector.multi_reduction <add>, %142, %cst_31 [1] : vector<8x4xf32> to vector<8xf32>
    %144 = vector.shape_cast %143 : vector<8xf32> to vector<8x1xf32>
    %145 = vector.broadcast %144 : vector<8x1xf32> to vector<8x4xf32>
    %146 = arith.divf %142, %145 : vector<8x4xf32>
    %147 = vector.extract_strided_slice %125 {offsets = [0, 0], sizes = [8, 16], strides = [1, 1]} : vector<8x96xf32> to vector<8x16xf32>
    %148 = vector.extract_strided_slice %136 {offsets = [0, 0], sizes = [8, 1], strides = [1, 1]} : vector<8x4xf32> to vector<8x1xf32>
    %149 = vector.broadcast %148 : vector<8x1xf32> to vector<8x16xf32>
    %150 = arith.mulf %147, %149 : vector<8x16xf32>
    %151 = vector.extract_strided_slice %125 {offsets = [0, 16], sizes = [8, 16], strides = [1, 1]} : vector<8x96xf32> to vector<8x16xf32>
    %152 = vector.extract_strided_slice %136 {offsets = [0, 1], sizes = [8, 1], strides = [1, 1]} : vector<8x4xf32> to vector<8x1xf32>
    %153 = vector.broadcast %152 : vector<8x1xf32> to vector<8x16xf32>
    %154 = arith.mulf %151, %153 : vector<8x16xf32>
    %155 = arith.addf %150, %154 : vector<8x16xf32>
    %156 = vector.extract_strided_slice %125 {offsets = [0, 64], sizes = [8, 16], strides = [1, 1]} : vector<8x96xf32> to vector<8x16xf32>
    %157 = vector.extract_strided_slice %136 {offsets = [0, 2], sizes = [8, 1], strides = [1, 1]} : vector<8x4xf32> to vector<8x1xf32>
    %158 = vector.broadcast %157 : vector<8x1xf32> to vector<8x16xf32>
    %159 = arith.mulf %156, %158 : vector<8x16xf32>
    %160 = arith.addf %155, %159 : vector<8x16xf32>
    %161 = vector.extract_strided_slice %125 {offsets = [0, 80], sizes = [8, 16], strides = [1, 1]} : vector<8x96xf32> to vector<8x16xf32>
    %162 = vector.extract_strided_slice %136 {offsets = [0, 3], sizes = [8, 1], strides = [1, 1]} : vector<8x4xf32> to vector<8x1xf32>
    %163 = vector.broadcast %162 : vector<8x1xf32> to vector<8x16xf32>
    %164 = arith.mulf %161, %163 : vector<8x16xf32>
    %165 = arith.addf %160, %164 : vector<8x16xf32>
    %166 = vector.extract_strided_slice %125 {offsets = [0, 32], sizes = [8, 16], strides = [1, 1]} : vector<8x96xf32> to vector<8x16xf32>
    %167 = vector.extract_strided_slice %146 {offsets = [0, 0], sizes = [8, 1], strides = [1, 1]} : vector<8x4xf32> to vector<8x1xf32>
    %168 = vector.broadcast %167 : vector<8x1xf32> to vector<8x16xf32>
    %169 = arith.mulf %166, %168 : vector<8x16xf32>
    %170 = vector.extract_strided_slice %125 {offsets = [0, 48], sizes = [8, 16], strides = [1, 1]} : vector<8x96xf32> to vector<8x16xf32>
    %171 = vector.extract_strided_slice %146 {offsets = [0, 1], sizes = [8, 1], strides = [1, 1]} : vector<8x4xf32> to vector<8x1xf32>
    %172 = vector.broadcast %171 : vector<8x1xf32> to vector<8x16xf32>
    %173 = arith.mulf %170, %172 : vector<8x16xf32>
    %174 = arith.addf %169, %173 : vector<8x16xf32>
    %175 = vector.extract_strided_slice %125 {offsets = [0, 64], sizes = [8, 16], strides = [1, 1]} : vector<8x96xf32> to vector<8x16xf32>
    %176 = vector.extract_strided_slice %146 {offsets = [0, 2], sizes = [8, 1], strides = [1, 1]} : vector<8x4xf32> to vector<8x1xf32>
    %177 = vector.broadcast %176 : vector<8x1xf32> to vector<8x16xf32>
    %178 = arith.mulf %175, %177 : vector<8x16xf32>
    %179 = arith.addf %174, %178 : vector<8x16xf32>
    %180 = vector.extract_strided_slice %125 {offsets = [0, 80], sizes = [8, 16], strides = [1, 1]} : vector<8x96xf32> to vector<8x16xf32>
    %181 = vector.extract_strided_slice %146 {offsets = [0, 3], sizes = [8, 1], strides = [1, 1]} : vector<8x4xf32> to vector<8x1xf32>
    %182 = vector.broadcast %181 : vector<8x1xf32> to vector<8x16xf32>
    %183 = arith.mulf %180, %182 : vector<8x16xf32>
    %184 = arith.addf %179, %183 : vector<8x16xf32>
    %185 = tpu.concatenate %165, %184 in 1 : vector<8x16xf32>, vector<8x16xf32> -> vector<8x32xf32>
    %c0_32 = arith.constant 0 : index
    %c0_33 = arith.constant 0 : index
    %186 = vector.load %arg9[%c0_32, %c0_33] : memref<32x32xf32, #tpu.memory_space<vmem>>, vector<32x32xf32>
    %cst_34 = arith.constant dense<0.000000e+00> : vector<8x32xf32>
    %187 = tpu.matmul %185, %186, %cst_34 {dimension_numbers = #tpu.dot_dimension_numbers<[1], [0], [0], [1], [0, 0, 1, 1], [], []>} : vector<8x32xf32>, vector<32x32xf32>, vector<8x32xf32> -> vector<8x32xf32>
    %c0_35 = arith.constant 0 : index
    %c0_36 = arith.constant 0 : index
    %188 = vector.load %arg10[%c0_35, %c0_36] : memref<1x32xf32, #tpu.memory_space<vmem>>, vector<1x32xf32>
    %189 = vector.broadcast %188 : vector<1x32xf32> to vector<8x32xf32>
    %190 = arith.addf %187, %189 : vector<8x32xf32>
    %cst_37 = arith.constant 0.000000e+00 : f32
    %191 = vector.broadcast %cst_37 : f32 to vector<8x32xf32>
    %192 = arith.maximumf %190, %191 : vector<8x32xf32>
    %c0_38 = arith.constant 0 : index
    %c0_39 = arith.constant 0 : index
    %193 = vector.load %arg11[%c0_38, %c0_39] : memref<32x2xf32, #tpu.memory_space<vmem>>, vector<32x2xf32>
    %cst_40 = arith.constant dense<0.000000e+00> : vector<8x2xf32>
    %194 = tpu.matmul %192, %193, %cst_40 {dimension_numbers = #tpu.dot_dimension_numbers<[1], [0], [0], [1], [0, 0, 1, 1], [], []>} : vector<8x32xf32>, vector<32x2xf32>, vector<8x2xf32> -> vector<8x2xf32>
    %c0_41 = arith.constant 0 : index
    %c0_42 = arith.constant 0 : index
    %195 = vector.load %arg12[%c0_41, %c0_42] : memref<1x2xf32, #tpu.memory_space<vmem>>, vector<1x2xf32>
    %196 = vector.broadcast %195 : vector<1x2xf32> to vector<8x2xf32>
    %197 = arith.addf %194, %196 : vector<8x2xf32>
    %c0_43 = arith.constant 0 : index
    %c0_44 = arith.constant 0 : index
    %198 = vector.load %arg13[%c0_43, %c0_44] : memref<8x2xf32, #tpu.memory_space<vmem>>, vector<8x2xf32>
    tpu.vector_store %arg13[%c0_43, %c0_44], %197 {strides = array<i32>} : memref<8x2xf32, #tpu.memory_space<vmem>>, vector<8x2xf32>,
    return
  }
}

</mosaic_0001>

<bundles_post_ra>
// kernel: tpu_custom_call.1
= control target key start
LH: loop header
LB: loop body
LE: loop exit
PB: predicated region body
PF: predicated region fallthrough
CT: control target
= control target key end

     0   :  { %18 = vsyncpa [#allocation3], 0  ;;  %s1318_s0 = inlined_call_operand.hbm [shape: f32[8,32], index: 0, kind: input, shape index: {}]   ;;  %s1319_s1 = inlined_call_operand.hbm [shape: f32[32,206], index: 1, kind: input, shape index: {}]   ;;  %s1320_s2 = inlined_call_operand.vmem [shape: f32[1,206], index: 2, kind: input, shape index: {}]   ;;  %s1321_s3 = inlined_call_operand.hbm [shape: f32[192,96], index: 3, kind: input, shape index: {}]   ;;  %s1322_s4 = inlined_call_operand.hbm [shape: f32[1,96], index: 4, kind: input, shape index: {}]   ;;  %s1323_s5 = inlined_call_operand.hbm [shape: f32[48,200], index: 5, kind: input, shape index: {}]   ;;  %s1324_s6 = inlined_call_operand.vmem [shape: f32[1,200], index: 6, kind: input, shape index: {}]   ;;  %s1325_s7 = inlined_call_operand.hbm [shape: f32[192,96], index: 7, kind: input, shape index: {}]   ;;  %s1326_s8 = inlined_call_operand.vmem [shape: f32[1,96], index: 8, kind: input, shape index: {}]   ;;  %s1327_s9 = inlined_call_operand.vmem [shape: f32[32,32], index: 9, kind: input, shape index: {}]   ;;  %s1328_s10 = inlined_call_operand.vmem [shape: f32[1,32], index: 10, kind: input, shape index: {}]   ;;  %s1329_s11 = inlined_call_operand.vmem [shape: f32[32,2], index: 11, kind: input, shape index: {}]   ;;  %s1330_s12 = inlined_call_operand.vmem [shape: f32[1,2], index: 12, kind: input, shape index: {}]   ;;  %s1331_s13 = inlined_call_operand.vmem [shape: f32[8,2], index: 13, kind: output, shape index: {}]  }
   0x1   :  { %19 = vsyncpa [#allocation5], 0 }
   0x2   :  { %20 = vsyncpa [#allocation8], 0  ;;  %s37_s27 = sshll.u32 %s1319_s1, 4  ;;  %s38_s27 = int_to_ptr.hbm [resolvable:$true] %s37_s27 }
   0x3   :  { %21 = vsyncpa [#allocation11], 0  ;;  %s1074_s28 = smov [#allocation4]   ;;  %s66_s15 = sshll.u32 %s1322_s4, 4  ;;  %s67_s15 = int_to_ptr.hbm [resolvable:$true] %s66_s15 }
   0x4   :  { %s39_s29 = sshll.u32 %s1074_s28, 4  ;;  %s1075_s16 = smov 256   ;;  %s40_s29 = int_to_ptr.vmem [resolvable:$true] %s39_s29 }
   0x5   :  { %s1076_s17 = smov 16   ;;  %s1077_s18 = smov [#allocation7]  }
   0x6   :  { %45 = dma.hbm_to_vmem [thread:$0]  %s38_s27, 1024, %s40_s29, [#allocation5], %s1075_s16, %s1075_s16, %s1076_s17  }
   0x7   :  { %s68_s19 = sshll.u32 %s1077_s18, 4  ;;  %s27_s21 = sshll.u32 %s1318_s0, 4  ;;  %s69_s19 = int_to_ptr.vmem [resolvable:$true] %s68_s19  ;;  %s28_s21 = int_to_ptr.hbm [resolvable:$true] %s27_s21 }
   0x8   :  { %71 = dma.hbm_to_vmem [thread:$0]  %s67_s15, 16, %s69_s19, [#allocation8]  }
   0x9   :  { %s52_s4 = sshll.u32 %s1321_s3, 4  ;;  %s1078_s24 = smov [#allocation2]   ;;  %s53_s4 = int_to_ptr.hbm [resolvable:$true] %s52_s4 }
   0xa   :  { %s29_s25 = sshll.u32 %s1078_s24, 4  ;;  %s1079_s26 = smov [#allocation6]   ;;  %s30_s25 = int_to_ptr.vmem [resolvable:$true] %s29_s25 }
   0xb   :  { %32 = dma.hbm_to_vmem [thread:$0]  %s28_s21, 128, %s30_s25, [#allocation3]  }
   0xc   :  { %s54_s27 = sshll.u32 %s1079_s26, 4  ;;  %s1080_s28 = smov 128   ;;  %s55_s27 = int_to_ptr.vmem [resolvable:$true] %s54_s27 }
   0xd   :  { %s1081_s29 = smov 8   ;;  %s76_s14 = sshll.u32 %s1323_s5, 4  ;;  %s77_s14 = int_to_ptr.hbm [resolvable:$true] %s76_s14 }
   0xe   :  { %60 = dma.hbm_to_vmem [thread:$0]  %s53_s4, 3072, %s55_s27, [#allocation5], %s1080_s28, %s1080_s28, %s1081_s29  }
   0xf   :  { %s1082_s15 = smov [#allocation9]   ;;  %s91_s20 = sshll.u32 %s1325_s7, 4  ;;  %s92_s20 = int_to_ptr.hbm [resolvable:$true] %s91_s20 }
  0x10   :  { %s78_s18 = sshll.u32 %s1082_s15, 4  ;;  %s1083_s1 = smov [#allocation10]   ;;  %s79_s18 = int_to_ptr.vmem [resolvable:$true] %s78_s18 }
  0x11   :  { %84 = dma.hbm_to_vmem [thread:$0]  %s77_s14, 1536, %s79_s18, [#allocation8], %s1075_s16, %s1075_s16, %s1076_s17  }
  0x12   :  { %s93_s21 = sshll.u32 %s1083_s1, 4  ;;  %s94_s21 = int_to_ptr.vmem [resolvable:$true] %s93_s21 }
  0x13   :  { %99 = dma.hbm_to_vmem [thread:$0]  %s92_s20, 3072, %s94_s21, [#allocation11], %s1080_s28, %s1080_s28, %s1081_s29  }
  0x14   :  { %1066 = dma.done.wait [#allocation3], 128  }
  0x15   :  { %1067 = vsyncadd [#allocation3], 4294967168 }
  0x16   :  { %1068 = dma.done.wait [#allocation5], 4096  }
  0x17   :  { %1069 = vsyncadd [#allocation5], 4294963200 }
  0x18   :  { %1070 = dma.done.wait [#allocation8], 1552  }
  0x19   :  { %1071 = vsyncadd [#allocation8], 4294965744 }
  0x1a   :  { %1072 = dma.done.wait [#allocation11], 3072  }
  0x1b   :  { %1073 = vsyncadd [#allocation11], 4294964224  ;;  %v141_v0 = vld [vmem:[#allocation4 + $0x30] sm:$0xff]  ;;  %v142_v1 = vld [vmem:[#allocation4 + $0x38] sm:$0xff]  ;;  %vm149_vm0 = vcmask 261120   ;;  %vm326_vm1 = vcmask 638528  }
  0x1c   :  { %v139_v2 = vld [vmem:[#allocation4 + $0x20] sm:$0xff]  ;;  %165 = vmatpush.msra.mxu0 %v141_v0  ;;  %185 = vmatpush.msra.mxu1 %v142_v1  ;;  %v140_v3 = vld [vmem:[#allocation4 + $0x28] sm:$0xff]  ;;  %v137_v4 = vld [vmem:[#allocation4 + $0x10] sm:$0xff]  ;;  %vm267_vm2 = vcmask 556544   ;;  %vm223_vm3 = vcmask 523264   ;;  %vm297_vm4 = vcmask 589344  }
  0x1d   :  { %v138_v5 = vld [vmem:[#allocation4 + $0x18] sm:$0xff]  ;;  %v209_v7 = vld [vmem:[#allocation6 + $0x70] sm:$0xff]  ;;  %v135_v8 = vld [vmem:[#allocation4] sm:$0xff]  ;;  %s1085_s16 = smov 64   ;;  %s1086_s17 = smov 60   ;;  %vm278_vm5 = vcmask 31744  }
  0x1e   :  { %166 = vmatpush.msra.mxu0 %v139_v2  ;;  %186 = vmatpush.msra.mxu1 %v140_v3  ;;  %v210_v6 = vld [vmem:[#allocation6 + $0x78] sm:$0xff]  ;;  %v136_v9 = vld [vmem:[#allocation4 + $0x8] sm:$0xff]  ;;  %v207_v13 = vld [vmem:[#allocation6 + $0x60] sm:$0xff]  ;;  %vm337_vm6 = vcmask 48128   ;;  %v1087_v63 = vmov 69   ;;  %v1088_v1 = vmov 75  }
  0x1f   :  { %227 = vmatpush.msra.mxu2 %v210_v6  ;;  %v134_v10 = vld [vmem:[#allocation2] sm:$0xff]  ;;  %v208_v11 = vld [vmem:[#allocation6 + $0x68] sm:$0xff]  ;;  %v217_v14 = vld [vmem:[#allocation6 + $0xb0] sm:$0xff]  ;;  %878 = vset.pattern.permute.xlu1 %v1087_v63  ;;  %v1089_v2 = vmov 73   ;;  %s1100_s22 = smov 112   ;;  %s1102_s23 = smov 96  }
  0x20   :  { %167 = vmatpush.msra.mxu0 %v137_v4  ;;  %187 = vmatpush.msra.mxu1 %v138_v5  ;;  %v218_v12 = vld [vmem:[#allocation6 + $0xb8] sm:$0xff]  ;;  %v216_v16 = vld [vmem:[#allocation6 + $0xa8] sm:$0xff]  ;;  %v205_v17 = vld [vmem:[#allocation6 + $0x50] sm:$0xff]  ;;  %s1103_s4 = smov 80   ;;  %s1104_s24 = smov 48  }
  0x21   :  { %228 = vmatpush.msra.mxu2 %v209_v7  ;;  %v206_v15 = vld [vmem:[#allocation6 + $0x58] sm:$0xff]  ;;  %255 = vmatpush.msra.mxu3 %v218_v12  ;;  %v215_v18 = vld [vmem:[#allocation6 + $0xa0] sm:$0xff]  ;;  %v204_v19 = vld [vmem:[#allocation6 + $0x48] sm:$0xff]  ;;  %s1105_s25 = smov 32  }
  0x22   :  { %168 = vmatpush.msra.mxu0 %v135_v8  ;;  %188 = vmatpush.msra.mxu1 %v136_v9  ;;  %v214_v20 = vld [vmem:[#allocation6 + $0x98] sm:$0xff]  ;;  %v203_v21 = vld [vmem:[#allocation6 + $0x40] sm:$0xff]  ;;  %v201_v23 = vld [vmem:[#allocation6 + $0x30] sm:$0xff] }
  0x23   :  { %836 = vmatmul.msk.f32.vlgmr.msra.gmra.mxu0 %vm149_vm0, %v134_v10  ;;  %837 = vmatmul.msk.f32.vlgmr.msra.gmra.mxu1 %vm149_vm0, %v134_v10  ;;  %v202_v22 = vld [vmem:[#allocation6 + $0x38] sm:$0xff]  ;;  %v200_v24 = vld [vmem:[#allocation6 + $0x28] sm:$0xff]  ;;  %v199_v25 = vld [vmem:[#allocation6 + $0x20] sm:$0xff] }
  0x24   :  { %229 = vmatpush.msra.mxu2 %v208_v11  ;;  %256 = vmatpush.msra.mxu3 %v217_v14  ;;  %v198_v26 = vld [vmem:[#allocation6 + $0x18] sm:$0xff]  ;;  %v197_v27 = vld [vmem:[#allocation6 + $0x10] sm:$0xff]  ;;  %v196_v29 = vld [vmem:[#allocation6 + $0x8] sm:$0xff] }
  0x25   :  { %v213_v28 = vld [vmem:[#allocation6 + $0x90] sm:$0xff]  ;;  %v212_v30 = vld [vmem:[#allocation6 + $0x88] sm:$0xff]  ;;  %v195_v31 = vld [vmem:[#allocation6] sm:$0xff]  ;;  %879 = vset.pattern.permute.xlu0 %v1088_v1  ;;  %876 = vset.pattern.permute.xlu2 %v1089_v2 }
  0x26   :  { %230 = vmatpush.msra.mxu2 %v207_v13  ;;  %257 = vmatpush.msra.mxu3 %v216_v16  ;;  %v211_v32 = vld [vmem:[#allocation6 + $0x80] sm:$0xff]  ;;  %v143_v33 = vld [vmem:[%s1320_s2] sm:$0x3]  ;;  %s1084_s2 = smov 56  }
  0x27   :  { %v145_v34 = vperm.slane %v143_v33, 0  ;;  %v146_v35 = vperm.slane %v143_v33, 1 }
  0x28   :  { %231 = vmatpush.msra.mxu2 %v206_v15  ;;  %258 = vmatpush.msra.mxu3 %v215_v18 }
  0x2a   :  { %232 = vmatpush.msra.mxu2 %v205_v17  ;;  %259 = vmatpush.msra.mxu3 %v214_v20 }
  0x2c   :  { %233 = vmatpush.msra.mxu2 %v204_v19  ;;  %260 = vmatpush.msra.mxu3 %v213_v28  ;;  %v1092_v28 = vmov 68  }
  0x2e   :  { %234 = vmatpush.msra.mxu2 %v203_v21  ;;  %261 = vmatpush.msra.mxu3 %v212_v30 }
  0x30   :  { %235 = vmatpush.msra.mxu2 %v202_v22  ;;  %262 = vmatpush.msra.mxu3 %v211_v32  ;;  %v1090_v22 = vmov 77  }
  0x32   :  { %236 = vmatpush.msra.mxu2 %v201_v23 }
  0x34   :  { %237 = vmatpush.msra.mxu2 %v200_v24 }
  0x36   :  { %238 = vmatpush.msra.mxu2 %v199_v25 }
  0x38   :  { %239 = vmatpush.msra.mxu2 %v198_v26 }
  0x3a   :  { %240 = vmatpush.msra.mxu2 %v197_v27  ;;  %v1091_v27 = vmov 74  }
  0x3c   :  { %241 = vmatpush.msra.mxu2 %v196_v29  ;;  %v1093_v29 = vmov 70  }
  0x3e   :  { %242 = vmatpush.msra.mxu2 %v195_v31  ;;  %v1094_v31 = vmov 76  }
  0xa0   :  { %v170_v36 = vpop.f32.mrf.mxu0  ;;  %v190_v37 = vpop.f32.mrf.mxu1 }
  0xa1   :  { %v171_v38 = vadd.f32 %v170_v36, %v145_v34  ;;  %v191_v39 = vadd.f32 %v190_v37, %v146_v35  ;;  %v1095_v35 = vmov 71  }
  0xa3   :  { %v193_v40 = vmax.f32 %v171_v38, 0.0  ;;  %v327_v41 = vsel %vm326_vm1, %v191_v39, -inf  ;;  %v268_v42 = vsel %vm267_vm2, %v191_v39, -inf  ;;  %v194_v43 = vmax.f32 %v191_v39, 0.0 }
  0xa4   :  { %328 = vmax.xlane.f32.xlu0 %v327_v41  ;;  %269 = vmax.xlane.f32.xlu1 %v268_v42  ;;  %v298_v44 = vsel %vm297_vm4, %v191_v39, -inf }
  0xa5   :  { %243 = vmatmul.f32.vlgmr.msra.gmra.mxu2 %v193_v40  ;;  %838 = vmatmul.msk.f32.vlgmr.msra.gmra.mxu3 %vm223_vm3, %v194_v43  ;;  %v1096_v40 = vmov 72  }
  0xac   :  { %299 = vmax.xlane.f32.xlu0 %v298_v44 }
 0x117   :  { %v329_v45 = vpop.xlane.xlu0 %328  ;;  %v270_v46 = vpop.xlane.xlu1 %269 }
 0x118   :  { %v330_v47 = vsub.f32 %v191_v39, %v329_v45  ;;  %v271_v48 = vsub.f32 %v191_v39, %v270_v46  ;;  %v1097_v45 = vmov 65   ;;  %v1098_v46 = vmov 66  }
 0x11a   :  { %v331_v49 = vmul.f32 1.442695, %v330_v47  ;;  %v272_v50 = vmul.f32 1.442695, %v271_v48  ;;  %v1099_v47 = vmov 67  }
 0x11b   :  { %v898_v48 = vld [vmem:[#allocation7] ss:$0 sm:$0xff] }
 0x11c   :  { %902 = vpow2.f32 %v331_v49 }
 0x11d   :  { %904 = vpow2.f32 %v272_v50 }
 0x11f   :  { %v300_v51 = vpop.xlane.xlu0 %299 }
 0x120   :  { %v301_v52 = vsub.f32 %v191_v39, %v300_v51 }
 0x122   :  { %v1208_v53 = vpop.eup %902  ;;  %v302_v54 = vmul.f32 1.442695, %v301_v52 }
 0x123   :  { %v1210_v55 = vpop.eup %904  ;;  %334 = vrot.lane.b32.xlu1 %v1208_v53, %s1084_s2 }
 0x124   :  { %906 = vpow2.f32 %v302_v54  ;;  %275 = vrot.lane.b32.xlu0 %v1210_v55, %s1085_s16 }
 0x128   :  { %v244_v49 = vpop.f32.mrf.mxu2  ;;  %v264_v51 = vpop.f32.mrf.mxu3 }
 0x129   :  { %v245_v50 = vadd.f32 %v898_v48, %v244_v49  ;;  %v574_v48 = vld [vmem:[#allocation10 + $0x78] sm:$0xff]  ;;  %v573_v49 = vld [vmem:[#allocation10 + $0x70] sm:$0xff] }
 0x12a   :  { %v907_v56 = vpop.eup %906  ;;  %590 = vmatpush.msrb.mxu3 %v574_v48 }
 0x12b   :  { %305 = vrot.lane.b32.xlu2 %v907_v56, %s1086_s17  ;;  %v1225_v52 = vadd.f32 %v264_v51, %v245_v50  ;;  %v572_v50 = vld [vmem:[#allocation10 + $0x68] sm:$0xff]  ;;  %v582_v51 = vld [vmem:[#allocation10 + $0xb8] sm:$0xff] }
 0x12c   :  { %591 = vmatpush.msrb.mxu3 %v573_v49 }
 0x12e   :  { %592 = vmatpush.msrb.mxu3 %v572_v50 }
 0x185   :  { %v306_v57 = vpop.permute.xlu2 %305 }
 0x186   :  { %v308_v58 = vsel %vm278_vm5, %v306_v57, 0.0 }
 0x187   :  { %309 = vadd.xlane.f32.xlu1 %v308_v58 }
 0x195   :  { %v335_v59 = vpop.permute.xlu1 %334 }
 0x196   :  { %v276_v60 = vpop.permute.xlu0 %275  ;;  %v338_v61 = vsel %vm337_vm6, %v335_v59, 0.0 }
 0x197   :  { %v279_v62 = vsel %vm278_vm5, %v276_v60, 0.0  ;;  %339 = vadd.xlane.f32.xlu2 %v338_v61 }
 0x198   :  { %280 = vadd.xlane.f32.xlu0 %v279_v62 }
 0x1fa   :  { %v310_v0 = vpop.xlane.xlu1 %309 }
 0x1fb   :  { %908 = vrcp.f32 %v310_v0  ;;  %v322_v7 = vand.u32 2147483648, %v310_v0  ;;  %vm316_vm8 = vweird.f32 %v310_v0  ;;  %v320_v9 = vand.u32 2147483647, %v310_v0 }
 0x1fd   :  { %v323_v12 = vor.u32 1.1754944e-38, %v322_v7  ;;  %vm321_vm10 = vcmp.eq.f32.partialorder %v320_v9, 8.507059e+37 }
 0x201   :  { %v909_v3 = vpop.eup %908 }
 0x202   :  { %v312_v4 = vmul.f32 %v909_v3, %v310_v0  ;;  %vm317_vm7 = vweird.f32 %v909_v3 }
 0x203   :  { %vm318_vm9 = vmor %vm316_vm8, %vm317_vm7  ;;  %vm492_vm8 = vcmask 130048  }
 0x204   :  { %v313_v5 = vsub.f32 1.0, %v312_v4 }
 0x206   :  { %v314_v6 = vmul.f32 %v909_v3, %v313_v5 }
 0x208   :  { %v315_v8 = vadd.f32 %v909_v3, %v314_v6 }
 0x20a   :  { %v340_v10 = vpop.xlane.xlu2 %339  ;;  %v319_v11 = vsel %vm318_vm9, %v909_v3, %v315_v8  ;;  %vm513_vm9 = vcmask 392192  }
 0x20b   :  { %910 = vrcp.f32 %v340_v10  ;;  %v324_v13 = vsel %vm321_vm10, %v323_v12, %v319_v11  ;;  %v352_v18 = vand.u32 2147483648, %v340_v10  ;;  %v350_v20 = vand.u32 2147483647, %v340_v10  ;;  %v281_v30 = vpop.xlane.xlu0 %280 }
 0x20c   :  { %v325_v14 = vmul.f32 %v907_v56, %v324_v13  ;;  %vm346_vm12 = vweird.f32 %v340_v10  ;;  %912 = vrcp.f32 %v281_v30  ;;  %v293_v38 = vand.u32 2147483648, %v281_v30 }
 0x20d   :  { %v353_v23 = vor.u32 1.1754944e-38, %v352_v18  ;;  %vm351_vm14 = vcmp.eq.f32.partialorder %v350_v20, 8.507059e+37  ;;  %vm287_vm1 = vweird.f32 %v281_v30  ;;  %v291_v39 = vand.u32 2147483647, %v281_v30 }
 0x20e   :  { %399 = vperm.xlu1 %878, %v325_v14   ;;  %v294_v42 = vor.u32 1.1754944e-38, %v293_v38  ;;  %v502_v38 = vld [vmem:[#allocation9 + $0x38] sm:$0xff] }
 0x20f   :  { %vm292_vm7 = vcmp.eq.f32.partialorder %v291_v39, 8.507059e+37  ;;  %v499_v39 = vld [vmem:[#allocation9 + $0x20] sm:$0xff] }
 0x211   :  { %v911_v15 = vpop.eup %910 }
 0x212   :  { %v342_v16 = vmul.f32 %v911_v15, %v340_v10  ;;  %vm347_vm11 = vweird.f32 %v911_v15  ;;  %v913_v32 = vpop.eup %912 }
 0x213   :  { %vm348_vm13 = vmor %vm346_vm12, %vm347_vm11  ;;  %v283_v33 = vmul.f32 %v913_v32, %v281_v30  ;;  %vm288_vm15 = vweird.f32 %v913_v32 }
 0x214   :  { %v343_v17 = vsub.f32 1.0, %v342_v16  ;;  %vm289_vm6 = vmor %vm287_vm1, %vm288_vm15 }
 0x215   :  { %v284_v34 = vsub.f32 1.0, %v283_v33  ;;  %v505_v33 = vld [vmem:[#allocation9 + $0x50] sm:$0xff] }
 0x216   :  { %v344_v19 = vmul.f32 %v911_v15, %v343_v17  ;;  %883 = vset.pattern.permute.xlu1 %v1090_v22  ;;  %527 = vmatpush.msrb.mxu0 %v505_v33 }
 0x217   :  { %v285_v36 = vmul.f32 %v913_v32, %v284_v34  ;;  %v506_v34 = vld [vmem:[#allocation9 + $0x58] sm:$0xff] }
 0x218   :  { %v345_v21 = vadd.f32 %v911_v15, %v344_v19  ;;  %547 = vmatpush.msrb.mxu1 %v506_v34 }
 0x219   :  { %v286_v37 = vadd.f32 %v913_v32, %v285_v36  ;;  %v504_v36 = vld [vmem:[#allocation9 + $0x48] sm:$0xff] }
 0x21a   :  { %v349_v24 = vsel %vm348_vm13, %v911_v15, %v345_v21  ;;  %548 = vmatpush.msrb.mxu1 %v504_v36 }
 0x21b   :  { %v354_v25 = vsel %vm351_vm14, %v353_v23, %v349_v24  ;;  %v290_v41 = vsel %vm289_vm6, %v913_v32, %v286_v37  ;;  %v501_v37 = vld [vmem:[#allocation9 + $0x30] sm:$0xff]  ;;  %vm826_vm14 = vcmask 15360  }
 0x21c   :  { %v355_v26 = vmul.f32 %v1208_v53, %v354_v25  ;;  %v295_v43 = vsel %vm292_vm7, %v294_v42, %v290_v41  ;;  %549 = vmatpush.msrb.mxu1 %v502_v38  ;;  %v497_v41 = vld [vmem:[#allocation9 + $0x10] sm:$0xff]  ;;  %v498_v42 = vld [vmem:[#allocation9 + $0x18] sm:$0xff] }
 0x21d   :  { %v296_v44 = vmul.f32 %v1210_v55, %v295_v43  ;;  %v1101_v55 = vmov 64   ;;  %v495_v43 = vld [vmem:[#allocation9] sm:$0xff] }
 0x21e   :  { %455 = vperm.xlu0 %879, %v355_v26   ;;  %435 = vperm.xlu2 %876, %v355_v26  }
 0x21f   :  { %475 = vperm.xlu1 %883, %v355_v26  }
 0x226   :  { %877 = vset.pattern.permute.xlu2 %v1091_v27  ;;  %889 = vset.pattern.permute.xlu0 %v1101_v55 }
 0x227   :  { %886 = vset.pattern.permute.xlu1 %v1092_v28  ;;  %445 = vperm.xlu2 %877, %v355_v26  }
 0x228   :  { %394 = vperm.xlu1 %886, %v325_v14  }
 0x22f   :  { %880 = vset.pattern.permute.xlu2 %v1093_v29 }
 0x230   :  { %409 = vperm.xlu2 %880, %v325_v14   ;;  %890 = vset.pattern.permute.xlu1 %v1087_v63 }
 0x238   :  { %881 = vset.pattern.permute.xlu2 %v1094_v31 }
 0x239   :  { %465 = vperm.xlu2 %881, %v355_v26  }
 0x241   :  { %882 = vset.pattern.permute.xlu2 %v1095_v35 }
 0x242   :  { %419 = vperm.xlu2 %882, %v325_v14  }
 0x24a   :  { %884 = vset.pattern.permute.xlu2 %v1096_v40  ;;  %v500_v40 = vld [vmem:[#allocation9 + $0x28] sm:$0xff] }
 0x24b   :  { %430 = vperm.xlu2 %884, %v355_v26   ;;  %550 = vmatpush.msrb.mxu1 %v500_v40 }
 0x24d   :  { %551 = vmatpush.msrb.mxu1 %v498_v42 }
 0x253   :  { %885 = vset.pattern.permute.xlu2 %v1097_v45 }
 0x254   :  { %363 = vperm.xlu2 %885, %v296_v44  }
 0x25c   :  { %887 = vset.pattern.permute.xlu2 %v1098_v46 }
 0x25d   :  { %373 = vperm.xlu2 %887, %v296_v44  }
 0x265   :  { %888 = vset.pattern.permute.xlu2 %v1099_v47 }
 0x266   :  { %383 = vperm.xlu2 %888, %v296_v44  }
 0x26e   :  { %891 = vset.pattern.permute.xlu2 %v1093_v29 }
 0x278   :  { %v436_v53 = vpop.permute.xlu2 %435 }
 0x279   :  { %v438_v54 = vmul.f32 %v436_v53, %v1225_v52  ;;  %v581_v53 = vld [vmem:[#allocation10 + $0xb0] sm:$0xff] }
 0x27b   :  { %440 = vrot.lane.b32.xlu1 %v438_v54, %s1100_s22  ;;  %v571_v54 = vld [vmem:[#allocation10 + $0x60] sm:$0xff] }
 0x27c   :  { %593 = vmatpush.msrb.mxu3 %v571_v54 }
 0x280   :  { %v400_v57 = vpop.permute.xlu1 %399 }
 0x281   :  { %v446_v56 = vpop.permute.xlu2 %445  ;;  %v402_v59 = vmul.f32 %v400_v57, %v1225_v52  ;;  %v570_v57 = vld [vmem:[#allocation10 + $0x58] sm:$0xff] }
 0x282   :  { %v448_v58 = vmul.f32 %v446_v56, %v1225_v52  ;;  %v580_v56 = vld [vmem:[#allocation10 + $0xa8] sm:$0xff]  ;;  %594 = vmatpush.msrb.mxu3 %v570_v57 }
 0x283   :  { %404 = vrot.lane.b32.xlu1 %v402_v59, %s1100_s22  ;;  %v569_v59 = vld [vmem:[#allocation10 + $0x50] sm:$0xff] }
 0x284   :  { %450 = vrot.lane.b32.xlu0 %v448_v58, %s1102_s23  ;;  %v579_v58 = vld [vmem:[#allocation10 + $0xa0] sm:$0xff]  ;;  %595 = vmatpush.msrb.mxu3 %v569_v59 }
 0x28a   :  { %v410_v60 = vpop.permute.xlu2 %409 }
 0x28b   :  { %v412_v61 = vmul.f32 %v410_v60, %v1225_v52  ;;  %v578_v60 = vld [vmem:[#allocation10 + $0x98] sm:$0xff] }
 0x28d   :  { %414 = vrot.lane.b32.xlu1 %v412_v61, %s1102_s23  ;;  %v568_v61 = vld [vmem:[#allocation10 + $0x48] sm:$0xff] }
 0x28e   :  { %596 = vmatpush.msrb.mxu3 %v568_v61 }
 0x290   :  { %v456_v62 = vpop.permute.xlu0 %455 }
 0x291   :  { %v458_v63 = vmul.f32 %v456_v62, %v1225_v52  ;;  %v476_v0 = vpop.permute.xlu1 %475  ;;  %v567_v62 = vld [vmem:[#allocation10 + $0x40] sm:$0xff] }
 0x292   :  { %v478_v1 = vmul.f32 %v476_v0, %v1225_v52  ;;  %597 = vmatpush.msrb.mxu3 %v567_v62 }
 0x293   :  { %v466_v2 = vpop.permute.xlu2 %465  ;;  %460 = vrot.lane.b32.xlu0 %v458_v63, %s1103_s4  ;;  %v566_v63 = vld [vmem:[#allocation10 + $0x38] sm:$0xff] }
 0x294   :  { %v468_v3 = vmul.f32 %v466_v2, %v1225_v52  ;;  %598 = vmatpush.msrb.mxu3 %v566_v63 }
 0x295   :  { %480 = vrot.lane.b32.xlu1 %v478_v1, %s1104_s24  ;;  %v565_v1 = vld [vmem:[#allocation10 + $0x30] sm:$0xff] }
 0x296   :  { %599 = vmatpush.msrb.mxu3 %v565_v1 }
 0x29a   :  { %v395_v13 = vpop.permute.xlu1 %394 }
 0x29b   :  { %470 = vrot.lane.b32.xlu0 %v468_v3, %s1085_s16  ;;  %v397_v16 = vmul.f32 %v395_v13, %v1225_v52  ;;  %v564_v3 = vld [vmem:[#allocation10 + $0x28] sm:$0xff] }
 0x29c   :  { %v420_v4 = vpop.permute.xlu2 %419  ;;  %600 = vmatpush.msrb.mxu3 %v564_v3 }
 0x29d   :  { %v422_v5 = vmul.f32 %v420_v4, %v1225_v52 }
 0x29f   :  { %424 = vrot.lane.b32.xlu2 %v422_v5, %s1103_s4 }
 0x2a3   :  { %358 = vperm.xlu0 %889, %v296_v44   ;;  %v496_v44 = vld [vmem:[#allocation9 + $0x8] sm:$0xff] }
 0x2a4   :  { %552 = vmatpush.msrb.mxu1 %v496_v44 }
 0x2a5   :  { %v431_v6 = vpop.permute.xlu2 %430 }
 0x2a6   :  { %v433_v24 = vmul.f32 %v431_v6, %v1225_v52  ;;  %v563_v6 = vld [vmem:[#allocation10 + $0x20] sm:$0xff] }
 0x2a7   :  { %601 = vmatpush.msrb.mxu3 %v563_v6 }
 0x2ab   :  { %892 = vset.pattern.permute.xlu0 %v1095_v35  ;;  %v503_v35 = vld [vmem:[#allocation9 + $0x40] sm:$0xff] }
 0x2ac   :  { %528 = vmatpush.msrb.mxu0 %v503_v35 }
 0x2ae   :  { %v364_v7 = vpop.permute.xlu2 %363  ;;  %529 = vmatpush.msrb.mxu0 %v501_v37 }
 0x2af   :  { %v366_v8 = vmul.f32 %v364_v7, %v1225_v52 }
 0x2b0   :  { %530 = vmatpush.msrb.mxu0 %v499_v39 }
 0x2b1   :  { %368 = vrot.lane.b32.xlu2 %v366_v8, %s1100_s22  ;;  %v562_v8 = vld [vmem:[#allocation10 + $0x18] sm:$0xff] }
 0x2b2   :  { %531 = vmatpush.msrb.mxu0 %v497_v41  ;;  %602 = vmatpush.msrb.mxu3 %v562_v8 }
 0x2b4   :  { %532 = vmatpush.msrb.mxu0 %v495_v43 }
 0x2b6   :  { %618 = vmatpush.msra.mxu0 %v582_v51 }
 0x2b7   :  { %v374_v9 = vpop.permute.xlu2 %373 }
 0x2b8   :  { %v376_v10 = vmul.f32 %v374_v9, %v1225_v52  ;;  %619 = vmatpush.msra.mxu0 %v581_v53 }
 0x2ba   :  { %378 = vrot.lane.b32.xlu1 %v376_v10, %s1085_s16  ;;  %620 = vmatpush.msra.mxu0 %v580_v56 }
 0x2bc   :  { %621 = vmatpush.msra.mxu0 %v579_v58 }
 0x2be   :  { %622 = vmatpush.msra.mxu0 %v578_v60 }
 0x2c0   :  { %v384_v11 = vpop.permute.xlu2 %383 }
 0x2c1   :  { %v386_v12 = vmul.f32 %v384_v11, %v1225_v52 }
 0x2c3   :  { %388 = vrot.lane.b32.xlu2 %v386_v12, %s1104_s24 }
 0x2ed   :  { %v441_v14 = vpop.permute.xlu1 %440 }
 0x2ee   :  { %v443_v25 = vadd.f32 %v441_v14, %v433_v24 }
 0x2f5   :  { %v405_v15 = vpop.permute.xlu1 %404 }
 0x2f6   :  { %v451_v17 = vpop.permute.xlu0 %450  ;;  %v407_v18 = vadd.f32 %v405_v15, %v397_v16  ;;  %v561_v15 = vld [vmem:[#allocation10 + $0x10] sm:$0xff] }
 0x2f7   :  { %v453_v26 = vadd.f32 %v451_v17, %v443_v25  ;;  %v577_v16 = vld [vmem:[#allocation10 + $0x90] sm:$0xff]  ;;  %603 = vmatpush.msrb.mxu3 %v561_v15  ;;  %v560_v17 = vld [vmem:[#allocation10 + $0x8] sm:$0xff] }
 0x2f8   :  { %623 = vmatpush.msra.mxu0 %v577_v16 }
 0x2f9   :  { %v425_v21 = vpop.permute.xlu2 %424  ;;  %604 = vmatpush.msrb.mxu3 %v560_v17 }
 0x2ff   :  { %v415_v19 = vpop.permute.xlu1 %414 }
 0x300   :  { %v417_v20 = vadd.f32 %v415_v19, %v407_v18  ;;  %v576_v18 = vld [vmem:[#allocation10 + $0x88] sm:$0xff]  ;;  %v559_v19 = vld [vmem:[#allocation10] sm:$0xff] }
 0x301   :  { %624 = vmatpush.msra.mxu0 %v576_v18  ;;  %605 = vmatpush.msrb.mxu3 %v559_v19 }
 0x302   :  { %v427_v22 = vadd.f32 %v425_v21, %v417_v20  ;;  %v575_v20 = vld [vmem:[#allocation10 + $0x80] sm:$0xff]  ;;  %v507_v21 = vld [vmem:[%s1324_s6] sm:$0x3] }
 0x303   :  { %625 = vmatpush.msra.mxu0 %v575_v20 }
 0x304   :  { %485 = vrot.lane.b32.xlu1 %v427_v22, %s1100_s22  ;;  %v509_v22 = vperm.slane %v507_v21, 0 }
 0x305   :  { %v461_v23 = vpop.permute.xlu0 %460 }
 0x306   :  { %v463_v27 = vadd.f32 %v461_v23, %v453_v26  ;;  %v510_v23 = vperm.slane %v507_v21, 1 }
 0x307   :  { %v481_v31 = vpop.permute.xlu1 %480 }
 0x30b   :  { %v369_v4 = vpop.permute.xlu2 %368 }
 0x30d   :  { %v471_v29 = vpop.permute.xlu0 %470 }
 0x30e   :  { %v473_v30 = vadd.f32 %v471_v29, %v463_v27 }
 0x310   :  { %v483_v32 = vadd.f32 %v481_v31, %v473_v30 }
 0x312   :  { %489 = vrot.lane.b32.xlu0 %v483_v32, %s1105_s25 }
 0x315   :  { %v359_v0 = vpop.permute.xlu0 %358 }
 0x316   :  { %v361_v2 = vmul.f32 %v359_v0, %v1225_v52 }
 0x318   :  { %v371_v7 = vadd.f32 %v369_v4, %v361_v2 }
 0x31d   :  { %v389_v10 = vpop.permute.xlu2 %388 }
 0x32c   :  { %v379_v5 = vpop.permute.xlu1 %378 }
 0x32d   :  { %v381_v9 = vadd.f32 %v379_v5, %v371_v7 }
 0x32f   :  { %v391_v12 = vadd.f32 %v389_v10, %v381_v9  ;;  %v899_v10 = vld [vmem:[%s1326_s8] ss:$0 sm:$0xff] }
 0x376   :  { %v486_v11 = vpop.permute.xlu1 %485 }
 0x377   :  { %v493_v13 = vsel %vm492_vm8, %v391_v12, %v486_v11 }
 0x384   :  { %v490_v14 = vpop.permute.xlu0 %489 }
 0x385   :  { %v494_v52 = vsel %vm149_vm0, %v493_v13, %v490_v14 }
 0x386   :  { %839 = vmatmul.msk.f32.vlgmr.msrb.gmra.mxu0 %vm513_vm9, %v494_v52  ;;  %840 = vmatmul.msk.f32.vlgmr.msrb.gmra.mxu1 %vm513_vm9, %v494_v52 }
 0x403   :  { %v534_v24 = vpop.f32.mrf.mxu0  ;;  %v554_v25 = vpop.f32.mrf.mxu1 }
 0x404   :  { %v535_v26 = vadd.f32 %v534_v24, %v509_v22  ;;  %v555_v27 = vadd.f32 %v554_v25, %v510_v23  ;;  %v766_v23 = vld [vmem:[%s1327_s9 + $0x18] sm:$0xff]  ;;  %v765_v24 = vld [vmem:[%s1327_s9 + $0x10] sm:$0xff]  ;;  %v764_v25 = vld [vmem:[%s1327_s9 + $0x8] sm:$0xff] }
 0x405   :  { %786 = vmatpush.msra.mxu1 %v766_v23 }
 0x406   :  { %v557_v29 = vmax.f32 %v535_v26, 0.0  ;;  %v658_v30 = vsel %vm297_vm4, %v555_v27, -inf  ;;  %v630_v31 = vsel %vm267_vm2, %v555_v27, -inf  ;;  %v558_v32 = vmax.f32 %v555_v27, 0.0  ;;  %v763_v26 = vld [vmem:[%s1327_s9] sm:$0xff] }
 0x407   :  { %659 = vmax.xlane.f32.xlu2 %v658_v30  ;;  %631 = vmax.xlane.f32.xlu1 %v630_v31 }
 0x408   :  { %606 = vmatmul.f32.vlgmr.msrb.gmra.mxu3 %v557_v29  ;;  %841 = vmatmul.msk.f32.vlgmr.msra.gmra.mxu0 %vm223_vm3, %v558_v32 }
 0x409   :  { %787 = vmatpush.msra.mxu1 %v765_v24 }
 0x40b   :  { %788 = vmatpush.msra.mxu1 %v764_v25 }
 0x40d   :  { %789 = vmatpush.msra.mxu1 %v763_v26 }
 0x47a   :  { %v660_v33 = vpop.xlane.xlu2 %659  ;;  %v632_v35 = vpop.xlane.xlu1 %631 }
 0x47b   :  { %v661_v34 = vsub.f32 %v555_v27, %v660_v33  ;;  %v633_v37 = vsub.f32 %v555_v27, %v632_v35  ;;  %v797_v35 = vld [vmem:[%s1329_s11 + $0x10] sm:$0xff] }
 0x47d   :  { %v662_v36 = vmul.f32 1.442695, %v661_v34  ;;  %v634_v38 = vmul.f32 1.442695, %v633_v37  ;;  %v798_v34 = vld [vmem:[%s1329_s11 + $0x18] sm:$0xff] }
 0x47e   :  { %818 = vmatpush.msrb.mxu1 %v798_v34 }
 0x47f   :  { %914 = vpow2.f32 %v662_v36 }
 0x480   :  { %916 = vpow2.f32 %v634_v38  ;;  %819 = vmatpush.msrb.mxu1 %v797_v35 }
 0x485   :  { %v915_v39 = vpop.eup %914  ;;  %v627_v13 = vpop.f32.mrf.mxu0 }
 0x486   :  { %665 = vrot.lane.b32.xlu0 %v915_v39, %s1086_s17  ;;  %v917_v40 = vpop.eup %916 }
 0x48b   :  { %v607_v11 = vpop.f32.mrf.mxu3 }
 0x48c   :  { %v608_v12 = vadd.f32 %v899_v10, %v607_v11 }
 0x48e   :  { %637 = vrot.lane.b32.xlu0 %v917_v40, %s1085_s16 }
 0x4f8   :  { %v666_v41 = vpop.permute.xlu0 %665 }
 0x4f9   :  { %v668_v42 = vsel %vm278_vm5, %v666_v41, 0.0 }
 0x4fa   :  { %669 = vadd.xlane.f32.xlu0 %v668_v42 }
 0x500   :  { %v638_v43 = vpop.permute.xlu0 %637 }
 0x501   :  { %v640_v44 = vsel %vm278_vm5, %v638_v43, 0.0 }
 0x502   :  { %641 = vadd.xlane.f32.xlu2 %v640_v44 }
 0x56d   :  { %v670_v48 = vpop.xlane.xlu0 %669 }
 0x56e   :  { %918 = vrcp.f32 %v670_v48  ;;  %v682_v54 = vand.u32 2147483648, %v670_v48  ;;  %v680_v57 = vand.u32 2147483647, %v670_v48  ;;  %vm676_vm3 = vweird.f32 %v670_v48 }
 0x570   :  { %v683_v60 = vor.u32 1.1754944e-38, %v682_v54  ;;  %vm681_vm10 = vcmp.eq.f32.partialorder %v680_v57, 8.507059e+37  ;;  %v901_v57 = vld [vmem:[%s1330_s12] ss:$0 sm:$0xff] }
 0x574   :  { %v919_v49 = vpop.eup %918 }
 0x575   :  { %v672_v50 = vmul.f32 %v919_v49, %v670_v48  ;;  %v642_v51 = vpop.xlane.xlu2 %641  ;;  %vm677_vm2 = vweird.f32 %v919_v49 }
 0x576   :  { %920 = vrcp.f32 %v642_v51  ;;  %vm678_vm4 = vmor %vm676_vm3, %vm677_vm2  ;;  %v654_v2 = vand.u32 2147483648, %v642_v51  ;;  %v652_v4 = vand.u32 2147483647, %v642_v51  ;;  %vm648_vm11 = vweird.f32 %v642_v51 }
 0x577   :  { %v673_v53 = vsub.f32 1.0, %v672_v50  ;;  %v795_v50 = vld [vmem:[%s1329_s11] sm:$0xff] }
 0x578   :  { %v655_v6 = vor.u32 1.1754944e-38, %v654_v2  ;;  %vm653_vm13 = vcmp.eq.f32.partialorder %v652_v4, 8.507059e+37 }
 0x579   :  { %v674_v56 = vmul.f32 %v919_v49, %v673_v53 }
 0x57b   :  { %v675_v58 = vadd.f32 %v919_v49, %v674_v56 }
 0x57c   :  { %v921_v59 = vpop.eup %920 }
 0x57d   :  { %v644_v61 = vmul.f32 %v921_v59, %v642_v51  ;;  %v679_v62 = vsel %vm678_vm4, %v919_v49, %v675_v58  ;;  %vm649_vm5 = vweird.f32 %v921_v59  ;;  %v796_v49 = vld [vmem:[%s1329_s11 + $0x8] sm:$0xff]  ;;  %v900_v51 = vld [vmem:[%s1328_s10] ss:$0 sm:$0xff] }
 0x57e   :  { %v684_v63 = vsel %vm681_vm10, %v683_v60, %v679_v62  ;;  %vm650_vm12 = vmor %vm648_vm11, %vm649_vm5  ;;  %820 = vmatpush.msrb.mxu1 %v796_v49 }
 0x57f   :  { %v645_v0 = vsub.f32 1.0, %v644_v61  ;;  %v685_v1 = vmul.f32 %v915_v39, %v684_v63 }
 0x580   :  { %821 = vmatpush.msrb.mxu1 %v795_v50 }
 0x581   :  { %v646_v3 = vmul.f32 %v921_v59, %v645_v0  ;;  %749 = vperm.xlu0 %892, %v685_v1   ;;  %739 = vperm.xlu2 %891, %v685_v1  }
 0x582   :  { %729 = vperm.xlu1 %890, %v685_v1  }
 0x583   :  { %v647_v5 = vadd.f32 %v921_v59, %v646_v3 }
 0x585   :  { %v651_v7 = vsel %vm650_vm12, %v921_v59, %v647_v5 }
 0x586   :  { %v656_v8 = vsel %vm653_vm13, %v655_v6, %v651_v7 }
 0x587   :  { %v657_v9 = vmul.f32 %v917_v40, %v656_v8 }
 0x589   :  { %894 = vset.pattern.permute.xlu2 %v1092_v28  ;;  %v628_v28 = vadd.f32 %v627_v13, %v608_v12 }
 0x58a   :  { %893 = vset.pattern.permute.xlu1 %v1097_v45  ;;  %724 = vperm.xlu2 %894, %v685_v1  }
 0x58b   :  { %693 = vperm.xlu1 %893, %v657_v9  }
 0x592   :  { %897 = vset.pattern.permute.xlu2 %v1101_v55 }
 0x593   :  { %895 = vset.pattern.permute.xlu1 %v1098_v46 }
 0x594   :  { %703 = vperm.xlu1 %895, %v657_v9  }
 0x59c   :  { %896 = vset.pattern.permute.xlu1 %v1099_v47 }
 0x59d   :  { %713 = vperm.xlu1 %896, %v657_v9  }
 0x5db   :  { %v740_v46 = vpop.permute.xlu2 %739 }
 0x5dc   :  { %v742_v55 = vmul.f32 %v740_v46, %v628_v28 }
 0x5e4   :  { %v725_v21 = vpop.permute.xlu2 %724 }
 0x5e5   :  { %v727_v27 = vmul.f32 %v725_v21, %v628_v28 }
 0x5f3   :  { %v750_v14 = vpop.permute.xlu0 %749 }
 0x5f4   :  { %v752_v45 = vmul.f32 %v750_v14, %v628_v28  ;;  %v730_v52 = vpop.permute.xlu1 %729 }
 0x5f5   :  { %v732_v15 = vmul.f32 %v730_v52, %v628_v28 }
 0x5f6   :  { %754 = vrot.lane.b32.xlu1 %v752_v45, %s1103_s4 }
 0x5f7   :  { %734 = vrot.lane.b32.xlu2 %v732_v15, %s1100_s22 }
 0x5fd   :  { %v694_v47 = vpop.permute.xlu1 %693 }
 0x5fe   :  { %v696_v16 = vmul.f32 %v694_v47, %v628_v28 }
 0x5ff   :  { %744 = vrot.lane.b32.xlu2 %v742_v55, %s1102_s23 }
 0x600   :  { %698 = vrot.lane.b32.xlu1 %v696_v16, %s1100_s22 }
 0x606   :  { %v704_v17 = vpop.permute.xlu1 %703 }
 0x607   :  { %v706_v18 = vmul.f32 %v704_v17, %v628_v28  ;;  %688 = vperm.xlu2 %897, %v657_v9  }
 0x609   :  { %708 = vrot.lane.b32.xlu0 %v706_v18, %s1085_s16 }
 0x60f   :  { %v714_v19 = vpop.permute.xlu1 %713 }
 0x610   :  { %v716_v20 = vmul.f32 %v714_v19, %v628_v28 }
 0x612   :  { %718 = vrot.lane.b32.xlu2 %v716_v20, %s1104_s24 }
 0x651   :  { %v735_v22 = vpop.permute.xlu2 %734 }
 0x652   :  { %v737_v30 = vadd.f32 %v735_v22, %v727_v27 }
 0x659   :  { %v745_v29 = vpop.permute.xlu2 %744 }
 0x65a   :  { %v747_v31 = vadd.f32 %v745_v29, %v737_v30 }
 0x661   :  { %v689_v36 = vpop.permute.xlu2 %688 }
 0x662   :  { %v691_v38 = vmul.f32 %v689_v36, %v628_v28 }
 0x668   :  { %v755_v32 = vpop.permute.xlu1 %754 }
 0x669   :  { %v757_v33 = vadd.f32 %v755_v32, %v747_v31 }
 0x66b   :  { %759 = vrot.lane.b32.xlu1 %v757_v33, %s1100_s22 }
 0x66c   :  { %v719_v42 = vpop.permute.xlu2 %718 }
 0x672   :  { %v699_v37 = vpop.permute.xlu1 %698 }
 0x673   :  { %v701_v40 = vadd.f32 %v699_v37, %v691_v38 }
 0x67b   :  { %v709_v39 = vpop.permute.xlu0 %708 }
 0x67c   :  { %v711_v41 = vadd.f32 %v709_v39, %v701_v40 }
 0x67e   :  { %v721_v43 = vadd.f32 %v719_v42, %v711_v41 }
 0x6dd   :  { %v760_v44 = vpop.permute.xlu1 %759 }
 0x6de   :  { %v762_v48 = vsel %vm492_vm8, %v721_v43, %v760_v44 }
 0x6df   :  { %842 = vmatmul.msk.f32.vlgmr.msra.gmra.mxu1 %vm149_vm0, %v762_v48 }
 0x75c   :  { %v791_v53 = vpop.f32.mrf.mxu1 }
 0x75d   :  { %v792_v54 = vadd.f32 %v900_v51, %v791_v53 }
 0x75f   :  { %v794_v56 = vmax.f32 %v792_v54, 0.0 }
 0x761   :  { %843 = vmatmul.msk.f32.vlgmr.msrb.gmra.mxu1 %vm149_vm0, %v794_v56 }
 0x7de   :  { %v823_v58 = vpop.f32.mrf.mxu1 }
 0x7df   :  { %v824_v59 = vadd.f32 %v901_v57, %v823_v58 }
 0x7e1   :  { %827 = vst.msk [vmem:[%s1331_s13] sm:$0xff] %vm826_vm14, %v824_v59 }
 0x7e2   :  { %832 = vsyncpa [#allocation3], 1 }
 0x7e3   :  { %833 = vsyncpa [#allocation5], 1 }
 0x7e4   :  { %834 = vsyncpa [#allocation8], 1 }
 0x7e5   :  { %835 = vsyncpa [#allocation11], 1 }

</bundles_post_ra>
